<compile_context>
chip_gen: v5e
topology: v5e:2x2
jax: 0.10.0
libtpu: 0.0.40
codegen_flags: <defaults>
</compile_context>

<pallas_src>
import jax
import jax.numpy as jnp
from jax.experimental import pallas as pl
from jax.experimental.pallas import tpu as pltpu


KERNEL_SIZE = 3
LANE = 128


def _round_up(x, m):
    return ((x + m - 1) // m) * m


def cnn_classifier_kernel(ids_ref, tab_ref, cw_ref, cb_ref, fw_ref, fb_ref,
                          out_ref):
    """Fused embed-gather + conv1d(k=3) + ReLU + global max-pool + linear.

    ids_ref: (TB, L)    int32     token ids for this batch tile
    tab_ref: (V, E)     bfloat16  embedding table
    cw_ref : (K*E, Cp)  bfloat16  folded Conv1d weight (tap-major rows, Cp=128-padded)
    cb_ref : (1, Cp)    float32   conv bias (zero-padded channels)
    fw_ref : (Cp, NCp)  bfloat16  Linear weight (padded, transposed vs. torch)
    fb_ref : (1, NCp)   float32   fc bias (zero-padded classes)
    out_ref: (TB, NCp)  float32   lane-dense padded logits
    """
    TB, L = ids_ref.shape
    V, E = tab_ref.shape
    KE = cw_ref.shape[0]
    K = KE // E
    T = L - K + 1                                  # valid conv output length

    # ---- Embedding gather fused as a one-hot matmul on the MXU -------------
    # TODO(synk): for a large vocab (table not VMEM-resident) switch this to a
    # scalar-prefetched DMA row gather instead of a one-hot matmul.
    ids = ids_ref[...]                                            # (TB, L) i32
    vocab_iota = jax.lax.broadcasted_iota(jnp.int32, (TB, L, V), 2)
    onehot = (vocab_iota == ids[:, :, None]).astype(jnp.bfloat16)
    emb = jax.lax.dot_general(                                    # (TB, L, E) f32
        onehot, tab_ref[...],
        dimension_numbers=(((2,), (0,)), ((), ())),
        preferred_element_type=jnp.float32)

    # ---- im2col via XLU sublane rolls; fold the K taps into ONE matmul -----
    # parts[k][b, t, :] == emb[b, (t + k) % L, :]   (np.roll semantics)
    parts = [emb]
    for k in range(1, K):
        parts.append(pltpu.roll(emb, L - k, axis=1))
    x = jnp.concatenate(parts, axis=-1).astype(jnp.bfloat16)      # (TB, L, K*E)

    conv = jax.lax.dot_general(                                   # (TB, L, Cp) f32
        x, cw_ref[...],
        dimension_numbers=(((2,), (0,)), ((), ())),
        preferred_element_type=jnp.float32)
    conv = jnp.maximum(conv + cb_ref[...], 0.0)                   # bias + ReLU

    # Rows t >= T carry wrapped-around taps; zero them so they can never win
    # the max (valid post-ReLU values are >= 0, so a 0 never changes it).
    t_iota = jax.lax.broadcasted_iota(jnp.int32, conv.shape, 1)
    conv = jnp.where(t_iota < T, conv, 0.0)

    pooled = jnp.max(conv, axis=1)                                # (TB, Cp) f32

    # TODO(synk): Dropout(0.5) is identity in eval mode; training-mode RNG mask omitted.

    logits = jnp.dot(pooled.astype(jnp.bfloat16), fw_ref[...],
                     preferred_element_type=jnp.float32) + fb_ref[...]
    out_ref[...] = logits.astype(out_ref.dtype)                   # (TB, NCp) lane-dense


def cnn_classifier_forward(token_ids, embed_table, conv_w, conv_b, fc_w, fc_b):
    """token_ids: (B, L) int32.  Returns logits (B, num_classes) float32."""
    B, L = token_ids.shape
    V, E = embed_table.shape
    K, E2, C = conv_w.shape
    assert E2 == E and K == KERNEL_SIZE and L >= K
    NC = fc_w.shape[1]

    Cp = _round_up(C, LANE)
    NCp = _round_up(NC, LANE)

    # Zero-padding keeps padded conv channels at 0 through ReLU + max-pool and
    # padded logit columns at 0; the padding is sliced away below.
    cw = jnp.zeros((K * E, Cp), jnp.bfloat16)
    cw = cw.at[:, :C].set(conv_w.reshape(K * E, C).astype(jnp.bfloat16))
    cb = jnp.zeros((1, Cp), jnp.float32).at[:, :C].set(
        conv_b.astype(jnp.float32)[None, :])
    fw = jnp.zeros((Cp, NCp), jnp.bfloat16).at[:C, :NC].set(
        fc_w.astype(jnp.bfloat16))
    fb = jnp.zeros((1, NCp), jnp.float32).at[:, :NC].set(
        fc_b.astype(jnp.float32)[None, :])
    tab = embed_table.astype(jnp.bfloat16)
    ids = token_ids.astype(jnp.int32)

    # Batch tile: second-minor block dim must be a multiple of 8 or == B.
    if B % 8 == 0:
        TB = min(B, 128)
        while B % TB:
            TB -= 8
    else:
        TB = B
    nb = B // TB

    cost = pl.CostEstimate(
        flops=(2 * B * L * V * E              # one-hot gather matmul
               + 2 * B * L * (K * E) * Cp     # folded conv matmul
               + 2 * B * Cp * NCp),           # fc matmul
        transcendentals=0,
        bytes_accessed=int(ids.size * 4 + tab.size * 2 + cw.size * 2
                           + cb.size * 4 + fw.size * 2 + fb.size * 4
                           + B * NCp * 4))

    out_padded = pl.pallas_call(
        cnn_classifier_kernel,
        out_shape=jax.ShapeDtypeStruct((B, NCp), jnp.float32),
        grid=(nb,),
        in_specs=[
            pl.BlockSpec((TB, L), lambda i: (i, 0)),       # token ids
            pl.BlockSpec((V, E), lambda i: (0, 0)),        # embedding table
            pl.BlockSpec((K * E, Cp), lambda i: (0, 0)),   # folded conv weight
            pl.BlockSpec((1, Cp), lambda i: (0, 0)),       # conv bias
            pl.BlockSpec((Cp, NCp), lambda i: (0, 0)),     # fc weight
            pl.BlockSpec((1, NCp), lambda i: (0, 0)),      # fc bias
        ],
        out_specs=pl.BlockSpec((TB, NCp), lambda i: (i, 0)),
        compiler_params=pltpu.CompilerParams(
            dimension_semantics=("parallel",),     # shards batch across v7x TCs
            vmem_limit_bytes=48 * 1024 * 1024),    # explicit, v7x-safe headroom
        cost_estimate=cost,
    )(ids, tab, cw, cb, fw, fb)

    return out_padded[:, :NC]


def reference_forward(token_ids, embed_table, conv_w, conv_b, fc_w, fc_b):
    """Independent f32 JAX reference mirroring the PyTorch module (eval mode)."""
    emb = embed_table[token_ids].astype(jnp.float32)        # (B, L, E)
    x = jnp.transpose(emb, (0, 2, 1))                       # NCW, like .permute(0,2,1)
    # conv_w here is (K, E, C); torch Conv1d weight is (C_out, C_in, K) = (C, E, K)
    w_oik = jnp.transpose(conv_w, (2, 1, 0))                # (C, E, K)
    y = jax.lax.conv_general_dilated(
        x, w_oik, window_strides=(1,), padding="VALID",
        dimension_numbers=("NCH", "OIH", "NCH"))            # (B, C, T)
    y = y + conv_b[None, :, None]
    y = jnp.maximum(y, 0.0)
    pooled = jnp.max(y, axis=2)                             # (B, C)
    return pooled @ fc_w + fc_b[None, :]


if __name__ == "__main__":
    VOCAB = 50
    EMBED_DIM = 32
    NUM_CLASSES = 4
    B, L = 2, 16
    C_OUT = 100

    key = jax.random.PRNGKey(0)
    k_tok, k_emb, k_cw, k_cb, k_fw, k_fb = jax.random.split(key, 6)

    token_ids = jax.random.randint(k_tok, (B, L), 0, VOCAB, dtype=jnp.int32)
    embed_table = jax.random.normal(k_emb, (VOCAB, EMBED_DIM), jnp.float32) * 0.1
    # Kernel layout: (K, E, C_out); torch layout would be (C_out, E, K).
    conv_w = jax.random.normal(k_cw, (KERNEL_SIZE, EMBED_DIM, C_OUT), jnp.float32) * 0.1
    conv_b = jax.random.normal(k_cb, (C_OUT,), jnp.float32) * 0.1
    # Kernel layout: (C_in, NC); torch Linear weight would be (NC, C_in).
    fc_w = jax.random.normal(k_fw, (C_OUT, NUM_CLASSES), jnp.float32) * 0.1
    fc_b = jax.random.normal(k_fb, (NUM_CLASSES,), jnp.float32) * 0.1

    out = cnn_classifier_forward(token_ids, embed_table, conv_w, conv_b, fc_w, fc_b)
    out = jax.block_until_ready(out)

    ref = reference_forward(token_ids, embed_table, conv_w, conv_b, fc_w, fc_b)
    ref = jax.block_until_ready(ref)

    assert out.shape == (B, NUM_CLASSES)
    # Kernel feeds the MXU bf16 inputs (f32 accumulation); allow ~1e-2 vs. the
    # pure-f32 reference.  Structural bugs produce O(0.1) errors and still fail.
    assert jnp.allclose(out, ref, rtol=2e-2, atol=2e-2), (out, ref)

    print("KERNEL_OK")
</pallas_src>

<mosaic_0001>
module attributes {stable_mosaic.version = 11 : i64} {
  func.func @cnn_classifier_kernel(%arg0: i32, %arg1: memref<2x16xi32, #tpu.memory_space<vmem>>, %arg2: memref<50x32xbf16, #tpu.memory_space<vmem>>, %arg3: memref<96x128xbf16, #tpu.memory_space<vmem>>, %arg4: memref<1x128xf32, #tpu.memory_space<vmem>>, %arg5: memref<128x128xbf16, #tpu.memory_space<vmem>>, %arg6: memref<1x128xf32, #tpu.memory_space<vmem>>, %arg7: memref<2x128xf32, #tpu.memory_space<vmem>>) attributes {dimension_semantics = [#tpu.dimension_semantics<parallel>], iteration_bounds = array<i64: 1>, scalar_prefetch = 0 : i64, scratch_operands = 0 : i64, tpu.core_type = #tpu.core_type<tc>, window_params = [{transform_indices = @transform_0, window_bounds = array<i64: 2, 16>}, {pipeline_mode = #tpu.pipeline_mode<synchronous>, transform_indices = @transform_1, window_bounds = array<i64: 50, 32>}, {pipeline_mode = #tpu.pipeline_mode<synchronous>, transform_indices = @transform_2, window_bounds = array<i64: 96, 128>}, {pipeline_mode = #tpu.pipeline_mode<synchronous>, transform_indices = @transform_3, window_bounds = array<i64: 1, 128>}, {pipeline_mode = #tpu.pipeline_mode<synchronous>, transform_indices = @transform_4, window_bounds = array<i64: 128, 128>}, {pipeline_mode = #tpu.pipeline_mode<synchronous>, transform_indices = @transform_5, window_bounds = array<i64: 1, 128>}, {transform_indices = @transform_6, window_bounds = array<i64: 2, 128>}]} {
    %c0 = arith.constant 0 : index
    %c0_0 = arith.constant 0 : index
    %0 = vector.load %arg1[%c0, %c0_0] : memref<2x16xi32, #tpu.memory_space<vmem>>, vector<2x16xi32>
    %1 = tpu.iota {dimensions = array<i32: 2>} : vector<2x16x50xi32>
    %2 = vector.shape_cast %0 : vector<2x16xi32> to vector<2x16x1xi32>
    %3 = vector.broadcast %2 : vector<2x16x1xi32> to vector<2x16x50xi32>
    %4 = arith.cmpi eq, %1, %3 : vector<2x16x50xi32>
    %5 = arith.extui %4 : vector<2x16x50xi1> to vector<2x16x50xi32>
    %6 = arith.sitofp %5 : vector<2x16x50xi32> to vector<2x16x50xf32>
    %7 = arith.truncf %6 : vector<2x16x50xf32> to vector<2x16x50xbf16>
    %c0_1 = arith.constant 0 : index
    %c0_2 = arith.constant 0 : index
    %8 = vector.load %arg2[%c0_1, %c0_2] : memref<50x32xbf16, #tpu.memory_space<vmem>>, vector<50x32xbf16>
    %cst = arith.constant dense<0.000000e+00> : vector<2x16x32xf32>
    %9 = tpu.matmul %7, %8, %cst {dimension_numbers = #tpu.dot_dimension_numbers<[2], [0], [0, 1], [1], [0, 0, 0, 1, 1, 1], [], []>} : vector<2x16x50xbf16>, vector<50x32xbf16>, vector<2x16x32xf32> -> vector<2x16x32xf32>
    %c15_i32 = arith.constant 15 : i32
    %10 = tpu.dynamic_rotate %9 by %c15_i32 dim 1 : vector<2x16x32xf32>, i32 -> vector<2x16x32xf32>
    %c14_i32 = arith.constant 14 : i32
    %11 = tpu.dynamic_rotate %9 by %c14_i32 dim 1 : vector<2x16x32xf32>, i32 -> vector<2x16x32xf32>
    %12 = tpu.concatenate %9, %10, %11 in 2 : vector<2x16x32xf32>, vector<2x16x32xf32>, vector<2x16x32xf32> -> vector<2x16x96xf32>
    %13 = arith.truncf %12 : vector<2x16x96xf32> to vector<2x16x96xbf16>
    %c0_3 = arith.constant 0 : index
    %c0_4 = arith.constant 0 : index
    %14 = vector.load %arg3[%c0_3, %c0_4] : memref<96x128xbf16, #tpu.memory_space<vmem>>, vector<96x128xbf16>
    %cst_5 = arith.constant dense<0.000000e+00> : vector<2x16x128xf32>
    %15 = tpu.matmul %13, %14, %cst_5 {dimension_numbers = #tpu.dot_dimension_numbers<[2], [0], [0, 1], [1], [0, 0, 0, 1, 1, 1], [], []>} : vector<2x16x96xbf16>, vector<96x128xbf16>, vector<2x16x128xf32> -> vector<2x16x128xf32>
    %c0_6 = arith.constant 0 : index
    %c0_7 = arith.constant 0 : index
    %16 = vector.load %arg4[%c0_6, %c0_7] : memref<1x128xf32, #tpu.memory_space<vmem>>, vector<1x128xf32>
    %17 = vector.shape_cast %16 : vector<1x128xf32> to vector<1x1x128xf32>
    %18 = vector.broadcast %17 : vector<1x1x128xf32> to vector<2x16x128xf32>
    %19 = arith.addf %15, %18 : vector<2x16x128xf32>
    %cst_8 = arith.constant 0.000000e+00 : f32
    %20 = vector.broadcast %cst_8 : f32 to vector<2x16x128xf32>
    %21 = arith.maximumf %19, %20 : vector<2x16x128xf32>
    %22 = tpu.iota {dimensions = array<i32: 1>} : vector<2x16x128xi32>
    %c14_i32_9 = arith.constant 14 : i32
    %23 = vector.broadcast %c14_i32_9 : i32 to vector<2x16x128xi32>
    %24 = arith.cmpi slt, %22, %23 : vector<2x16x128xi32>
    %cst_10 = arith.constant 0.000000e+00 : f32
    %25 = vector.broadcast %cst_10 : f32 to vector<2x16x128xf32>
    %26 = arith.select %24, %21, %25 : vector<2x16x128xi1>, vector<2x16x128xf32>
    %cst_11 = arith.constant dense<0xFF800000> : vector<2x128xf32>
    %27 = vector.multi_reduction <maximumf>, %26, %cst_11 [1] : vector<2x16x128xf32> to vector<2x128xf32>
    %28 = arith.truncf %27 : vector<2x128xf32> to vector<2x128xbf16>
    %c0_12 = arith.constant 0 : index
    %c0_13 = arith.constant 0 : index
    %29 = vector.load %arg5[%c0_12, %c0_13] : memref<128x128xbf16, #tpu.memory_space<vmem>>, vector<128x128xbf16>
    %cst_14 = arith.constant dense<0.000000e+00> : vector<2x128xf32>
    %30 = tpu.matmul %28, %29, %cst_14 {dimension_numbers = #tpu.dot_dimension_numbers<[1], [0], [0], [1], [0, 0, 1, 1], [], []>} : vector<2x128xbf16>, vector<128x128xbf16>, vector<2x128xf32> -> vector<2x128xf32>
    %c0_15 = arith.constant 0 : index
    %c0_16 = arith.constant 0 : index
    %31 = vector.load %arg6[%c0_15, %c0_16] : memref<1x128xf32, #tpu.memory_space<vmem>>, vector<1x128xf32>
    %32 = vector.broadcast %31 : vector<1x128xf32> to vector<2x128xf32>
    %33 = arith.addf %30, %32 : vector<2x128xf32>
    %c0_17 = arith.constant 0 : index
    %c0_18 = arith.constant 0 : index
    %34 = vector.load %arg7[%c0_17, %c0_18] : memref<2x128xf32, #tpu.memory_space<vmem>>, vector<2x128xf32>
    tpu.vector_store %arg7[%c0_17, %c0_18], %33 {strides = array<i32>} : memref<2x128xf32, #tpu.memory_space<vmem>>, vector<2x128xf32>,
    return
  }
  func.func @transform_0(%arg0: i32) -> (i32, i32) {
    %c0_i32 = arith.constant 0 : i32
    %c0_i32_0 = arith.constant 0 : i32
    return %arg0, %c0_i32 : i32, i32
  }
  func.func @transform_1(%arg0: i32) -> (i32, i32) {
    %c0_i32 = arith.constant 0 : i32
    %c0_i32_0 = arith.constant 0 : i32
    %c0_i32_1 = arith.constant 0 : i32
    return %c0_i32, %c0_i32_0 : i32, i32
  }
  func.func @transform_2(%arg0: i32) -> (i32, i32) {
    %c0_i32 = arith.constant 0 : i32
    %c0_i32_0 = arith.constant 0 : i32
    %c0_i32_1 = arith.constant 0 : i32
    return %c0_i32, %c0_i32_0 : i32, i32
  }
  func.func @transform_3(%arg0: i32) -> (i32, i32) {
    %c0_i32 = arith.constant 0 : i32
    %c0_i32_0 = arith.constant 0 : i32
    %c0_i32_1 = arith.constant 0 : i32
    return %c0_i32, %c0_i32_0 : i32, i32
  }
  func.func @transform_4(%arg0: i32) -> (i32, i32) {
    %c0_i32 = arith.constant 0 : i32
    %c0_i32_0 = arith.constant 0 : i32
    %c0_i32_1 = arith.constant 0 : i32
    return %c0_i32, %c0_i32_0 : i32, i32
  }
  func.func @transform_5(%arg0: i32) -> (i32, i32) {
    %c0_i32 = arith.constant 0 : i32
    %c0_i32_0 = arith.constant 0 : i32
    %c0_i32_1 = arith.constant 0 : i32
    return %c0_i32, %c0_i32_0 : i32, i32
  }
  func.func @transform_6(%arg0: i32) -> (i32, i32) {
    %c0_i32 = arith.constant 0 : i32
    %c0_i32_0 = arith.constant 0 : i32
    return %arg0, %c0_i32 : i32, i32
  }
}

</mosaic_0001>

<bundles_post_ra>
// kernel: tpu_custom_call.1
= control target key start
LH: loop header
LB: loop body
LE: loop exit
PB: predicated region body
PF: predicated region fallthrough
CT: control target
= control target key end

     0   :  { %11 = vsyncpa [#allocation3], 0  ;;  %s785_s0 = inlined_call_operand.vmem [shape: s32[2,16], index: 0, kind: input, shape index: {}]   ;;  %s786_s1 = inlined_call_operand.vmem [shape: bf16[50,32], index: 1, kind: input, shape index: {}]   ;;  %s787_s2 = inlined_call_operand.hbm [shape: bf16[96,128], index: 2, kind: input, shape index: {}]   ;;  %s788_s3 = inlined_call_operand.vmem [shape: f32[1,128], index: 3, kind: input, shape index: {}]   ;;  %s789_s4 = inlined_call_operand.hbm [shape: bf16[128,128], index: 4, kind: input, shape index: {}]   ;;  %s790_s5 = inlined_call_operand.vmem [shape: f32[1,128], index: 5, kind: input, shape index: {}]   ;;  %s791_s6 = inlined_call_operand.hbm [shape: f32[2,128], index: 6, kind: output, shape index: {}]  }
   0x1   :  { %12 = vsyncpa [#allocation6], 0 }
   0x2   :  { %13 = vsyncpa [#allocation4], 0  ;;  %s22_s23 = sshll.u32 %s787_s2, 4  ;;  %s669_s24 = smov [#allocation2]   ;;  %s23_s23 = int_to_ptr.hbm [resolvable:$true] %s22_s23 }
   0x3   :  { %s24_s25 = sshll.u32 %s669_s24, 4  ;;  %s37_s28 = sshll.u32 %s789_s4, 4  ;;  %s25_s25 = int_to_ptr.vmem [resolvable:$true] %s24_s25  ;;  %s38_s28 = int_to_ptr.hbm [resolvable:$true] %s37_s28 }
   0x4   :  { %s670_s29 = smov 64   ;;  %s671_s30 = smov 4  }
   0x5   :  { %30 = dma.hbm_to_vmem [thread:$0]  %s23_s23, 768, %s25_s25, [#allocation3], %s670_s29, %s670_s29, %s671_s30  }
   0x6   :  { %s672_s7 = smov [#allocation5]  }
   0x7   :  { %s39_s8 = sshll.u32 %s672_s7, 4  ;;  %s40_s8 = int_to_ptr.vmem [resolvable:$true] %s39_s8 }
   0x8   :  { %45 = dma.hbm_to_vmem [thread:$0]  %s38_s28, 1024, %s40_s8, [#allocation6], %s670_s29, %s670_s29, %s671_s30  }
   0x9   :  { %663 = dma.done.wait [#allocation3], 768  }
   0xa   :  { %664 = vsyncadd [#allocation3], 4294966528 }
   0xb   :  { %665 = dma.done.wait [#allocation6], 1024  }
   0xc   :  { %666 = vsyncadd [#allocation6], 4294966272  ;;  %v58_v0 = vlaneseq  ;;  %v57_v2 = vld [vmem:[%s785_s0] sm:$0x3]  ;;  %v108_v6 = vld [vmem:[%s786_s1 + $0x18] sm:$0x1] }
   0xd   :  { %v73_v3 = vperm.slane %v57_v2, 1  ;;  %v60_v4 = vperm.slane %v57_v2, 0  ;;  %v132_v7 = vunpack.c.l.b16 %v108_v6  ;;  %vm147_vm0 = vcmask 1040384   ;;  %v537_v10 = vld [vmem:[%s786_s1 + $0x10] sm:$0xff]  ;;  %v536_v11 = vld [vmem:[%s786_s1 + $0x8] sm:$0xff]  ;;  %v535_v12 = vld [vmem:[%s786_s1] sm:$0xff] }
   0xe   :  { %v721_v1 = vshrl.u32 %v58_v0, 7  ;;  %v59_v13 = vand.u32 127, %v58_v0  ;;  %v673_v16 = vmov 0.0   ;;  %vm140_vm3 = vcmask 408576   ;;  %s674_s1 = smov 32   ;;  %v543_v40 = vld [vmem:[#allocation2 + $0x28] sm:$0xff] }
   0xf   :  { %v136_v8 = vpack.c.b16 %v132_v7, %v132_v7  ;;  %552 = vmatpush.bf16.msra.mxu3 %v543_v40  ;;  %v542_v42 = vld [vmem:[#allocation2 + $0x20] sm:$0xff]  ;;  %307 = vmatpush.bf16.msra.mxu1 %v543_v40  ;;  %v541_v59 = vld [vmem:[#allocation2 + $0x18] sm:$0xff]  ;;  %v540_v60 = vld [vmem:[#allocation2 + $0x10] sm:$0xff]  ;;  %vm222_vm8 = vcmask 261120   ;;  %vm227_vm9 = vcmask 523264   ;;  %vm298_vm10 = vcmask 785408  }
  0x10   :  { %567 = vset.pattern.permute.xlu1 %v721_v1  ;;  %565 = vset.pattern.permute.xlu0 %v721_v1  ;;  %v729_v5 = vadd.s32 8, %v721_v1  ;;  %vm176_vm6 = vcmp.lt.s32.totalorder %v721_v1, 7  ;;  %vm185_vm7 = vcmp.lt.s32.totalorder %v721_v1, 6  ;;  %v539_v61 = vld [vmem:[#allocation2 + $0x8] sm:$0xff]  ;;  %v538_v62 = vld [vmem:[#allocation2] sm:$0xff]  ;;  %vm375_vm12 = vcmask 1041409  }
  0x11   :  { %v149_v9 = vsel %vm147_vm0, %v136_v8, 0  ;;  %v589_v40 = vld [vmem:[%s788_s3] ss:$0 sm:$0xff]  ;;  %s675_s19 = smov [#allocation7]   ;;  %s448_s23 = sshll.u32 %s791_s6, 4  ;;  %s449_s23 = int_to_ptr.hbm [resolvable:$true] %s448_s23 }
  0x12   :  { %155 = vmatpush.bf16.msra.mxu0 %v149_v9  ;;  %vm330_vm11 = vcmp.lt.s32.totalorder %v729_v5, 14  ;;  %s446_s20 = sshll.u32 %s675_s19, 4  ;;  %s447_s20 = int_to_ptr.vmem [resolvable:$true] %s446_s20 }
  0x13   :  { %553 = vmatpush.bf16.msra.mxu3 %v542_v42  ;;  %308 = vmatpush.bf16.msra.mxu1 %v542_v42 }
  0x16   :  { %156 = vmatpush.bf16.msra.mxu0 %v537_v10 }
  0x17   :  { %554 = vmatpush.bf16.msra.mxu3 %v541_v59  ;;  %309 = vmatpush.bf16.msra.mxu1 %v541_v59 }
  0x18   :  { %78 = vperm.xlu1 %567, %v73_v3   ;;  %65 = vperm.xlu0 %565, %v60_v4  }
  0x1a   :  { %157 = vmatpush.bf16.msra.mxu0 %v536_v11 }
  0x1b   :  { %555 = vmatpush.bf16.msra.mxu3 %v540_v60  ;;  %310 = vmatpush.bf16.msra.mxu1 %v540_v60 }
  0x1e   :  { %158 = vmatpush.bf16.msra.mxu0 %v535_v12 }
  0x1f   :  { %556 = vmatpush.bf16.msra.mxu3 %v539_v61  ;;  %311 = vmatpush.bf16.msra.mxu1 %v539_v61 }
  0x20   :  { %568 = vset.pattern.permute.xlu1 %v729_v5  ;;  %566 = vset.pattern.permute.xlu0 %v729_v5 }
  0x23   :  { %557 = vmatpush.bf16.msra.mxu3 %v538_v62  ;;  %312 = vmatpush.bf16.msra.mxu1 %v538_v62 }
  0x28   :  { %84 = vperm.xlu1 %568, %v73_v3   ;;  %71 = vperm.xlu0 %566, %v60_v4  }
  0x8a   :  { %v66_v14 = vpop.permute.xlu0 %65  ;;  %v79_v15 = vpop.permute.xlu1 %78 }
  0x8b   :  { %vm86_vm1 = vcmp.eq.s32.totalorder %v59_v13, %v66_v14  ;;  %vm88_vm4 = vcmp.eq.s32.totalorder %v59_v13, %v79_v15 }
  0x8c   :  { %v459_v17 = vsel %vm86_vm1, 1.0, %v673_v16  ;;  %v461_v26 = vsel %vm88_vm4, 1.0, %v673_v16 }
  0x8d   :  { %v98_v19 = vpack.c.bf16 %v459_v17, %v459_v17  ;;  %v100_v28 = vpack.c.bf16 %v461_v26, %v461_v26 }
  0x8f   :  { %v113_v22 = vunpack.c.l.b16 %v98_v19  ;;  %v115_v30 = vunpack.c.l.b16 %v100_v28 }
  0x9a   :  { %v72_v18 = vpop.permute.xlu0 %71  ;;  %v85_v24 = vpop.permute.xlu1 %84 }
  0x9b   :  { %vm87_vm2 = vcmp.eq.s32.totalorder %v59_v13, %v72_v18  ;;  %vm89_vm5 = vcmp.eq.s32.totalorder %v59_v13, %v85_v24 }
  0x9c   :  { %v460_v20 = vsel %vm87_vm2, 1.0, %v673_v16  ;;  %v462_v27 = vsel %vm89_vm5, 1.0, %v673_v16 }
  0x9d   :  { %v99_v21 = vpack.c.bf16 %v460_v20, %v460_v20  ;;  %v101_v29 = vpack.c.bf16 %v462_v27, %v462_v27 }
  0x9f   :  { %v114_v23 = vunpack.c.l.b16 %v99_v21  ;;  %v116_v31 = vunpack.c.l.b16 %v101_v29 }
  0xa1   :  { %v117_v25 = vpack.c.b16 %v114_v23, %v113_v22  ;;  %v118_v32 = vpack.c.b16 %v116_v31, %v115_v30  ;;  %v551_v30 = vld [vmem:[#allocation5 + $0x38] sm:$0xff]  ;;  %v550_v31 = vld [vmem:[#allocation5 + $0x30] sm:$0xff] }
  0xa2   :  { %427 = vmatpush.bf16.msra.mxu2 %v551_v30 }
  0xa3   :  { %475 = vmatmul.msk.bf16.vlgmr.msra.gmra.mxu0 %vm140_vm3, %v117_v25 }
  0xa6   :  { %428 = vmatpush.bf16.msra.mxu2 %v550_v31 }
  0xb3   :  { %476 = vmatmul.msk.bf16.gmra.mxu0 %vm140_vm3, %v118_v32  ;;  %v549_v32 = vld [vmem:[#allocation5 + $0x28] sm:$0xff] }
  0xb4   :  { %429 = vmatpush.bf16.msra.mxu2 %v549_v32 }
 0x120   :  { %v745_v33 = vpop.f32.mrf.mxu0 }
 0x121   :  { %v170_v35 = vrot.slane %v745_v33, 1  ;;  %v181_v55 = vrot.slane %v745_v33, 2 }
 0x128   :  { %v747_v34 = vpop.f32.mrf.mxu0 }
 0x129   :  { %v172_v36 = vrot.slane %v747_v34, 1  ;;  %v183_v54 = vrot.slane %v747_v34, 2 }
 0x12b   :  { %v177_v37 = vsel %vm176_vm6, %v170_v35, %v172_v36  ;;  %v179_v38 = vsel %vm176_vm6, %v172_v36, %v170_v35  ;;  %v186_v56 = vsel %vm185_vm7, %v181_v55, %v183_v54  ;;  %v188_v57 = vsel %vm185_vm7, %v183_v54, %v181_v55  ;;  %v546_v35 = vld [vmem:[#allocation5 + $0x10] sm:$0xff]  ;;  %v545_v36 = vld [vmem:[#allocation5 + $0x8] sm:$0xff] }
 0x12c   :  { %v579_v39 = vpack.i.bf16 %v179_v38, %v177_v37  ;;  %v584_v58 = vpack.i.bf16 %v188_v57, %v186_v56  ;;  %v544_v37 = vld [vmem:[#allocation5] sm:$0xff] }
 0x12e   :  { %580 = vrot.lane.b32.xlu1 %v579_v39, %s674_s1 }
 0x130   :  { %v165_v41 = vpop.f32.mrf.mxu0 }
 0x131   :  { %v171_v44 = vrot.slane %v165_v41, 1  ;;  %v182_v50 = vrot.slane %v165_v41, 2 }
 0x138   :  { %v167_v43 = vpop.f32.mrf.mxu0 }
 0x139   :  { %v173_v45 = vrot.slane %v167_v43, 1  ;;  %v184_v49 = vrot.slane %v167_v43, 2 }
 0x13b   :  { %v178_v46 = vsel %vm176_vm6, %v171_v44, %v173_v45  ;;  %v180_v47 = vsel %vm176_vm6, %v173_v45, %v171_v44  ;;  %v187_v51 = vsel %vm185_vm7, %v182_v50, %v184_v49  ;;  %v189_v52 = vsel %vm185_vm7, %v184_v49, %v182_v50 }
 0x13c   :  { %v569_v48 = vpack.i.bf16 %v180_v47, %v178_v46  ;;  %v574_v53 = vpack.i.bf16 %v189_v52, %v187_v51 }
 0x13e   :  { %570 = vrot.lane.b32.xlu2 %v569_v48, %s674_s1 }
 0x146   :  { %575 = vrot.lane.b32.xlu2 %v574_v53, %s670_s29 }
 0x14e   :  { %585 = vrot.lane.b32.xlu2 %v584_v58, %s670_s29 }
 0x198   :  { %v571_v63 = vpop.permute.xlu2 %570 }
 0x199   :  { %v573_v0 = vunpack.i.h.bf16 %v571_v63  ;;  %v572_v1 = vunpack.i.l.bf16 %v571_v63 }
 0x19b   :  { %v226_v6 = vsel %vm222_vm8, %v167_v43, %v573_v0  ;;  %v225_v7 = vsel %vm222_vm8, %v165_v41, %v572_v1 }
 0x1a0   :  { %v576_v2 = vpop.permute.xlu2 %575  ;;  %v581_v8 = vpop.permute.xlu1 %580 }
 0x1a1   :  { %v578_v3 = vunpack.i.h.bf16 %v576_v2  ;;  %v577_v4 = vunpack.i.l.bf16 %v576_v2  ;;  %v583_v13 = vunpack.i.h.bf16 %v581_v8  ;;  %v582_v14 = vunpack.i.l.bf16 %v581_v8 }
 0x1a3   :  { %v230_v9 = vsel %vm227_vm9, %v225_v7, %v577_v4  ;;  %v231_v10 = vsel %vm227_vm9, %v226_v6, %v578_v3  ;;  %v224_v21 = vsel %vm222_vm8, %v747_v34, %v583_v13  ;;  %v223_v22 = vsel %vm222_vm8, %v745_v33, %v582_v14  ;;  %v548_v34 = vld [vmem:[#allocation5 + $0x20] sm:$0xff]  ;;  %v547_v33 = vld [vmem:[#allocation5 + $0x18] sm:$0xff] }
 0x1a4   :  { %v234_v11 = vpack.c.bf16 %v230_v9, %v230_v9  ;;  %v235_v12 = vpack.c.bf16 %v231_v10, %v231_v10  ;;  %430 = vmatpush.bf16.msra.mxu2 %v548_v34  ;;  %v590_v9 = vld [vmem:[%s790_s5] ss:$0 sm:$0xff] }
 0x1a6   :  { %v258_v15 = vunpack.c.l.b16 %v234_v11  ;;  %v259_v16 = vunpack.c.l.b16 %v235_v12 }
 0x1a8   :  { %v586_v17 = vpop.permute.xlu2 %585  ;;  %v261_v18 = vpack.c.b16 %v259_v16, %v258_v15  ;;  %431 = vmatpush.bf16.msra.mxu2 %v547_v33 }
 0x1a9   :  { %v588_v19 = vunpack.i.h.bf16 %v586_v17  ;;  %v587_v20 = vunpack.i.l.bf16 %v586_v17 }
 0x1aa   :  { %502 = vmatmul.msk.bf16.vlgmr.msra.gmra.mxu3 %vm298_vm10, %v261_v18 }
 0x1ab   :  { %v229_v23 = vsel %vm227_vm9, %v224_v21, %v588_v19  ;;  %v228_v24 = vsel %vm227_vm9, %v223_v22, %v587_v20 }
 0x1ac   :  { %v233_v25 = vpack.c.bf16 %v229_v23, %v229_v23  ;;  %v232_v26 = vpack.c.bf16 %v228_v24, %v228_v24  ;;  %432 = vmatpush.bf16.msra.mxu2 %v546_v35 }
 0x1ae   :  { %v257_v27 = vunpack.c.l.b16 %v233_v25  ;;  %v256_v28 = vunpack.c.l.b16 %v232_v26 }
 0x1b0   :  { %v260_v29 = vpack.c.b16 %v257_v27, %v256_v28  ;;  %433 = vmatpush.bf16.msra.mxu2 %v545_v36 }
 0x1b2   :  { %501 = vmatmul.msk.bf16.vlgmr.msra.gmra.mxu1 %vm298_vm10, %v260_v29 }
 0x1b4   :  { %434 = vmatpush.bf16.msra.mxu2 %v544_v37 }
 0x22d   :  { %v319_v38 = vpop.f32.mrf.mxu3 }
 0x22e   :  { %v320_v41 = vadd.f32 %v589_v40, %v319_v38 }
 0x22f   :  { %v314_v39 = vpop.f32.mrf.mxu1 }
 0x230   :  { %v315_v44 = vadd.f32 %v589_v40, %v314_v39  ;;  %v326_v48 = vmax.f32 %v320_v41, 0.0 }
 0x232   :  { %v324_v51 = vmax.f32 %v315_v44, 0.0 }
 0x235   :  { %v321_v42 = vpop.f32.mrf.mxu3 }
 0x236   :  { %v322_v43 = vadd.f32 %v589_v40, %v321_v42 }
 0x237   :  { %v316_v45 = vpop.f32.mrf.mxu1 }
 0x238   :  { %v327_v46 = vmax.f32 %v322_v43, 0.0  ;;  %v317_v47 = vadd.f32 %v589_v40, %v316_v45 }
 0x23a   :  { %v334_v49 = vsel %vm330_vm11, %v327_v46, 0.0  ;;  %v325_v50 = vmax.f32 %v317_v47, 0.0 }
 0x23b   :  { %v342_v52 = vmax.f32 %v326_v48, %v334_v49 }
 0x23c   :  { %v332_v53 = vsel %vm330_vm11, %v325_v50, 0.0 }
 0x23d   :  { %v343_v54 = vrot.slane %v342_v52, 4  ;;  %v335_v55 = vmax.f32 %v324_v51, %v332_v53 }
 0x23f   :  { %v344_v56 = vmax.f32 %v342_v52, %v343_v54  ;;  %v336_v57 = vrot.slane %v335_v55, 4 }
 0x241   :  { %v345_v58 = vrot.slane %v344_v56, 2  ;;  %v337_v59 = vmax.f32 %v335_v55, %v336_v57 }
 0x243   :  { %v346_v60 = vmax.f32 %v344_v56, %v345_v58  ;;  %v338_v61 = vrot.slane %v337_v59, 2 }
 0x245   :  { %v339_v62 = vmax.f32 %v337_v59, %v338_v61  ;;  %v347_v63 = vrot.slane %v346_v60, 1 }
 0x247   :  { %v340_v5 = vrot.slane %v339_v62, 1  ;;  %v348_v0 = vmax.f32 %v346_v60, %v347_v63 }
 0x249   :  { %v341_v1 = vmax.f32 %v339_v62, %v340_v5  ;;  %v350_v2 = vpack.c.bf16 %v348_v0, %v348_v0 }
 0x24b   :  { %v349_v3 = vpack.c.bf16 %v341_v1, %v341_v1  ;;  %v374_v6 = vunpack.c.l.b16 %v350_v2 }
 0x24d   :  { %v373_v4 = vunpack.c.l.b16 %v349_v3 }
 0x24f   :  { %v376_v7 = vsel %vm375_vm12, %v374_v6, %v373_v4 }
 0x250   :  { %v377_v8 = vpack.c.b16 %v376_v7, %v376_v7 }
 0x252   :  { %435 = vmatmul.bf16.vlgmr.msra.gmra.mxu2 %v377_v8 }
 0x2d5   :  { %v436_v10 = vpop.f32.mrf.mxu2 }
 0x2d6   :  { %v437_v11 = vadd.f32 %v590_v9, %v436_v10 }
 0x2d8   :  { %440 = vst [vmem:[#allocation7] sm:$0x3] %v437_v11 }
 0x2d9   :  { %451 = dma.vmem_to_hbm [thread:$0]  %s447_s20, 32, %s449_s23, [#allocation4]  }
 0x2dd   :  { %v438_v12 = vpop.f32.mrf.mxu2 }
 0x2de   :  { %667 = dma.done.wait [#allocation4], 32  }
 0x2df   :  { %668 = vsyncadd [#allocation4], 4294967264 }
 0x2e0   :  { %456 = vsyncpa [#allocation3], 1 }
 0x2e1   :  { %457 = vsyncpa [#allocation6], 1 }
 0x2e2   :  { %458 = vsyncpa [#allocation4], 1 }

</bundles_post_ra>
